<compile_context>
chip_gen: v7x
topology: tpu7x:2x2x1
jax: 0.10.0
libtpu: 0.0.40
codegen_flags: <defaults>
</compile_context>

<pallas_src>
import math
from math import gcd

import jax
import jax.numpy as jnp
from jax.experimental import pallas as pl
from jax.experimental.pallas import tpu as pltpu


def _make_kernel(out_dtype):
    def kernel(x_ref, wp_ref, out_ref):
        # x_ref:  (TM, Kp)  packed event times + ones column + zero K-padding
        # wp_ref: (Kp, L)   masked div_term rows, phase row, zero K-padding
        # out_ref:(TM, L)   lane-dense output tile (L multiple of 128)
        angle = jnp.dot(
            x_ref[...],
            wp_ref[...],
            preferred_element_type=jnp.float32,
            precision=jax.lax.Precision.HIGHEST,
        )
        out_ref[...] = jnp.sin(angle).astype(out_dtype)

    return kernel


def time_positional_encoding(x, div_term, out_dtype=jnp.float32):
    """x: [B, S] event times, div_term: [D] -> [B, S, D] temporal encoding."""
    x = x.astype(jnp.float32)
    div_term = div_term.astype(jnp.float32)
    B, S = x.shape
    D = int(div_term.shape[0])
    N = B * S

    # Lane packing: G consecutive positions per output row so L = G*D is a
    # multiple of 128 for every D (no masked vst).
    G = 128 // gcd(D, 128)
    L = G * D
    K = G + 1                         # + ones column that selects the phase row
    Kp = ((K + 7) // 8) * 8           # pad contraction dim to a sublane multiple

    # Phase trick: sin(a) for even features, cos(a) = sin(a + pi/2) for odd.
    d_idx = jnp.arange(D)
    phase = jnp.where(d_idx % 2 == 0, 0.0, jnp.pi / 2.0).astype(jnp.float32)

    # WP[g, c] = div_term[c % D] if c // D == g else 0   (rows 0..G-1)
    # WP[G, c] = phase[c % D]                            (phase row)
    # WP[G+1.., :] = 0                                   (K padding)
    c_idx = jnp.arange(L)
    div_packed = jnp.tile(div_term, G)                                   # (L,)
    w = (c_idx[None, :] // D == jnp.arange(G)[:, None]).astype(jnp.float32)
    w = w * div_packed[None, :]                                          # (G, L)
    phase_packed = jnp.tile(phase, G)[None, :]                           # (1, L)
    wp = jnp.concatenate(
        [w, phase_packed, jnp.zeros((Kp - K, L), jnp.float32)], axis=0
    )                                                                    # (Kp, L)

    # --- Row tiling ---------------------------------------------------------
    out_itemsize = jnp.dtype(out_dtype).itemsize
    sub = 16 if out_itemsize == 2 else 8          # sublane multiple for tm
    rows = (N + G - 1) // G
    rows_min = ((rows + sub - 1) // sub) * sub    # always sublane-aligned rows

    # Target ~2-4 MiB of f32 angle per tile (was capped at 512 KiB before).
    tm_cap = min(4096, (4 * 1024 * 1024) // (L * 4))
    tm_cap = max(sub, (tm_cap // sub) * sub)

    if rows_min <= 2 * sub:
        tm = rows_min                              # too small to split usefully
    else:
        # Cap tm so there are >= 2 grid steps (v7x: 2 TensorCores on "parallel").
        half = ((rows_min // 2 + sub - 1) // sub) * sub
        tm = min(tm_cap, half)
    padded_rows = ((rows_min + tm - 1) // tm) * tm
    grid_steps = padded_rows // tm

    # --- Pack the times: (padded_rows, G) + ones column + zero K padding -----
    x_flat = x.reshape(N)
    pad = padded_rows * G - N
    if pad:
        x_flat = jnp.concatenate([x_flat, jnp.zeros((pad,), jnp.float32)])
    x_rows = jnp.concatenate(
        [
            x_flat.reshape(padded_rows, G),
            jnp.ones((padded_rows, 1), jnp.float32),
            jnp.zeros((padded_rows, Kp - K), jnp.float32),
        ],
        axis=1,
    )                                              # (padded_rows, Kp)

    cost = pl.CostEstimate(
        flops=2 * padded_rows * Kp * L,
        transcendentals=padded_rows * L,
        bytes_accessed=padded_rows * Kp * 4
        + Kp * L * 4
        + padded_rows * L * out_itemsize,
    )

    out = pl.pallas_call(
        _make_kernel(out_dtype),
        out_shape=jax.ShapeDtypeStruct((padded_rows, L), out_dtype),
        grid_spec=pltpu.PrefetchScalarGridSpec(
            num_scalar_prefetch=0,
            grid=(grid_steps,),
            in_specs=[
                pl.BlockSpec((tm, Kp), lambda i: (i, 0)),
                pl.BlockSpec((Kp, L), lambda i: (0, 0)),
            ],
            out_specs=pl.BlockSpec((tm, L), lambda i: (i, 0)),
        ),
        compiler_params=pltpu.CompilerParams(
            dimension_semantics=("parallel",),
            vmem_limit_bytes=32 * 1024 * 1024,
        ),
        cost_estimate=cost,
    )(x_rows, wp)

    # (padded_rows, G*D) -> (padded_rows*G, D) -> drop padding -> (B, S, D)
    # TODO(synk): if the consumer can take the packed (rows, G*D) layout, skip
    # this reshape/slice to avoid a potential lane-relayout copy outside the
    # kernel (it would double HBM traffic on the output).
    return out.reshape(padded_rows * G, D)[:N].reshape(B, S, D)


def make_div_term(d_model: int) -> jax.Array:
    # Matches: exp(2 * (i // 2) * -(log(10000) / d_model)) for i in [0, d_model)
    i = jnp.arange(0, d_model, 1)
    return jnp.exp(
        2.0 * (i // 2).astype(jnp.float32) * (-(math.log(10000.0) / d_model))
    )


def reference(x: jax.Array, div_term: jax.Array) -> jax.Array:
    res = x[:, :, None] * div_term[None, None, :]
    idx = jnp.arange(div_term.shape[0])
    return jnp.where((idx % 2) == 0, jnp.sin(res), jnp.cos(res))


if __name__ == "__main__":
    B, S, D = 2, 8, 32  # batch, seq_len, d_model
    key = jax.random.PRNGKey(0)
    # time_seqs: non-negative event times
    x = jax.random.uniform(key, (B, S), dtype=jnp.float32, minval=0.0, maxval=10.0)
    div_term = make_div_term(D)

    out = jax.block_until_ready(time_positional_encoding(x, div_term))
    ref = reference(x, div_term)

    assert out.shape == (B, S, D)
    err = float(jnp.max(jnp.abs(out - ref)))
    assert jnp.allclose(out, ref, atol=1e-5, rtol=1e-5), err
    print("KERNEL_OK")
</pallas_src>

<mosaic_0001>
module attributes {stable_mosaic.version = 11 : i64} {
  func.func @kernel(%arg0: i32, %arg1: memref<8x8xf32, #tpu.memory_space<vmem>>, %arg2: memref<8x128xf32, #tpu.memory_space<vmem>>, %arg3: memref<8x128xf32, #tpu.memory_space<vmem>>) attributes {dimension_semantics = [#tpu.dimension_semantics<parallel>], iteration_bounds = array<i64: 1>, scalar_prefetch = 0 : i64, scratch_operands = 0 : i64, tpu.core_type = #tpu.core_type<tc>, window_params = [{transform_indices = @transform_0, window_bounds = array<i64: 8, 8>}, {pipeline_mode = #tpu.pipeline_mode<synchronous>, transform_indices = @transform_1, window_bounds = array<i64: 8, 128>}, {transform_indices = @transform_2, window_bounds = array<i64: 8, 128>}]} {
    %c0 = arith.constant 0 : index
    %c0_0 = arith.constant 0 : index
    %0 = vector.load %arg1[%c0, %c0_0] : memref<8x8xf32, #tpu.memory_space<vmem>>, vector<8x8xf32>
    %c0_1 = arith.constant 0 : index
    %c0_2 = arith.constant 0 : index
    %1 = vector.load %arg2[%c0_1, %c0_2] : memref<8x128xf32, #tpu.memory_space<vmem>>, vector<8x128xf32>
    %cst = arith.constant dense<0.000000e+00> : vector<8x128xf32>
    %2 = tpu.matmul %0, %1, %cst {dimension_numbers = #tpu.dot_dimension_numbers<[1], [0], [0], [1], [0, 0, 1, 1], [], []>, precision = #tpu.contract_precision<fp32>} : vector<8x8xf32>, vector<8x128xf32>, vector<8x128xf32> -> vector<8x128xf32>
    %3 = math.sin %2 : vector<8x128xf32>
    %c0_3 = arith.constant 0 : index
    %c0_4 = arith.constant 0 : index
    %4 = vector.load %arg3[%c0_3, %c0_4] : memref<8x128xf32, #tpu.memory_space<vmem>>, vector<8x128xf32>
    tpu.vector_store %arg3[%c0_3, %c0_4], %3 {strides = array<i32>} : memref<8x128xf32, #tpu.memory_space<vmem>>, vector<8x128xf32>,
    return
  }
  func.func @transform_0(%arg0: i32) -> (i32, i32) {
    %c0_i32 = arith.constant 0 : i32
    %c0_i32_0 = arith.constant 0 : i32
    return %arg0, %c0_i32 : i32, i32
  }
  func.func @transform_1(%arg0: i32) -> (i32, i32) {
    %c0_i32 = arith.constant 0 : i32
    %c0_i32_0 = arith.constant 0 : i32
    %c0_i32_1 = arith.constant 0 : i32
    return %c0_i32, %c0_i32_0 : i32, i32
  }
  func.func @transform_2(%arg0: i32) -> (i32, i32) {
    %c0_i32 = arith.constant 0 : i32
    %c0_i32_0 = arith.constant 0 : i32
    return %arg0, %c0_i32 : i32, i32
  }
}

</mosaic_0001>

<bundles_post_ra>
// kernel: tpu_custom_call.1
= control target key start
LH: loop header
LB: loop body
LE: loop exit
PB: predicated region body
PF: predicated region fallthrough
CT: control target
= control target key end

     0   :  { %7 = vsyncpa [#allocation3], 0  ;;  %s844_s0 = inlined_call_operand.hbm [shape: f32[8,8], index: 0, kind: input, shape index: {}]   ;;  %s845_s1 = inlined_call_operand.hbm [shape: f32[8,128], index: 1, kind: input, shape index: {}]   ;;  %s846_s2 = inlined_call_operand.hbm [shape: f32[8,128], index: 2, kind: output, shape index: {}]  }
   0x1   :  { %8 = vsyncpa [#allocation6], 0 }
   0x2   :  { %9 = vsyncpa [#allocation4], 0  ;;  %s755_s9 = smov [#allocation2]   ;;  %s756_s11 = smov [#allocation5]  }
   0x3   :  { %s16_s10 = sshll.u32 %s755_s9, 4  ;;  %s26_s12 = sshll.u32 %s756_s11, 4  ;;  %s17_s10 = int_to_ptr.vmem [resolvable:$true] %s16_s10  ;;  %s27_s12 = int_to_ptr.vmem [resolvable:$true] %s26_s12 }
   0x4   :  { %s683_s15 = scalar_lea.hbm %s844_s0, 128 }
   0x5   :  { %p684_p0 = scmp.ne.s32.totalorder %s844_s0, %s683_s15  ;;  %p687_p1 = scmp.lt.u32.totalorder %s683_s15, %s844_s0 }
   0x7   :  { %p689_p2 = pnand %p687_p1, %p684_p0 }
   0x9   :  { %692 = shalt.err (!%p689_p2)
}
   0xa   :  { %s693_s20 = scalar_lea.vmem %s17_s10, 128  ;;  %p698_p4 = scmp.lt.s32.totalorder %s17_s10, %s17_s10 }
   0xb   :  { %p694_p3 = scmp.ne.s32.totalorder %s17_s10, %s693_s20  ;;  %p699_p5 = scmp.lt.s32.totalorder %s693_s20, %s693_s20 }
   0xd   :  { %p700_p6 = por %p699_p5, %p698_p4 }
   0xf   :  { %p701_p7 = pnand %p700_p6, %p694_p3 }
  0x11   :  { %704 = shalt.err (!%p701_p7)
}
  0x12   :  { %19 = dma.hbm_to_vmem [thread:$0]  %s844_s0, 128, %s17_s10, [#allocation3]  }
  0x13   :  { %s705_s25 = scalar_lea.hbm %s845_s1, 128 }
  0x14   :  { %p706_p8 = scmp.ne.s32.totalorder %s845_s1, %s705_s25  ;;  %p709_p9 = scmp.lt.u32.totalorder %s705_s25, %s845_s1 }
  0x16   :  { %p711_p10 = pnand %p709_p9, %p706_p8 }
  0x18   :  { %714 = shalt.err (!%p711_p10)
}
  0x19   :  { %s715_s30 = scalar_lea.vmem %s27_s12, 128  ;;  %p720_p12 = scmp.lt.s32.totalorder %s27_s12, %s27_s12 }
  0x1a   :  { %p716_p11 = scmp.ne.s32.totalorder %s27_s12, %s715_s30  ;;  %p721_p13 = scmp.lt.s32.totalorder %s715_s30, %s715_s30 }
  0x1c   :  { %p722_p0 = por %p721_p13, %p720_p12 }
  0x1e   :  { %p723_p1 = pnand %p722_p0, %p716_p11 }
  0x20   :  { %726 = shalt.err (!%p723_p1)
}
  0x21   :  { %29 = dma.hbm_to_vmem [thread:$0]  %s845_s1, 128, %s27_s12, [#allocation6]  }
  0x22   :  { %749 = dma.done.wait [#allocation3], 128  }
  0x23   :  { %750 = vsyncadd [#allocation3], 4294967168 }
  0x24   :  { %751 = dma.done.wait [#allocation6], 128  }
  0x25   :  { %752 = vsyncadd [#allocation6], 4294967168  ;;  %v757_v0 = vmov 0.0   ;;  %vm758_vm0 = vmmov 0   ;;  %vm38_vm1 = vcmask 64512   ;;  %v37_v1 = vld [vmem:[#allocation5] sm:$0xff] }
  0x26   :  { %640 = vmatprep.subr.mxu0 %v757_v0  ;;  %642 = vmatprep.mubr.msk.f32.mxu0 %vm758_vm0, %v757_v0  ;;  %v36_v2 = vld [vmem:[#allocation2] sm:$0xff]  ;;  %v43_v3 = vand.u32 4294901760, %v37_v1  ;;  %v759_v29 = vmov 683565275   ;;  %v760_v31 = vmov 2475754826  }
  0x27   :  { %625 = vmatprep.subr.mxu1 %v757_v0  ;;  %627 = vmatprep.mubr.msk.f32.mxu1 %vm758_vm0, %v757_v0  ;;  %v40_v4 = vsel %vm38_vm1, %v36_v2, 0  ;;  %v761_v34 = vmov 2131351028   ;;  %v762_v37 = vmov 2102212464   ;;  %s765_s1 = smov [#allocation7]  }
  0x28   :  { %v108_v5 = vand.u32 4294901760, %v40_v4  ;;  %v120_v6 = vsub.f32 %v37_v1, %v43_v3  ;;  %641 = vmatpush3.msra.mxu0 %v43_v3  ;;  %626 = vmatpush3.msra.mxu1 %v43_v3  ;;  %v763_v40 = vmov 920167782   ;;  %v764_v43 = vmov 1326507024   ;;  %s599_s4 = sshll.u32 %s765_s1, 4  ;;  %s600_s4 = int_to_ptr.vmem [resolvable:$true] %s599_s4 }
  0x29   :  { %630 = vmatprep.subr.mxu1 %v757_v0  ;;  %645 = vmatprep.subr.mxu0 %v757_v0  ;;  %s727_s5 = scalar_lea.vmem %s600_s4, 128  ;;  %p732_p3 = scmp.lt.s32.totalorder %s600_s4, %s600_s4 }
  0x2a   :  { %v109_v7 = vsub.f32 %v40_v4, %v108_v5  ;;  %v121_v8 = vand.u32 4294901760, %v120_v6  ;;  %p728_p2 = scmp.ne.s32.totalorder %s600_s4, %s727_s5  ;;  %p733_p4 = scmp.lt.s32.totalorder %s727_s5, %s727_s5 }
  0x2c   :  { %v110_v9 = vand.u32 4294901760, %v109_v7  ;;  %v122_v10 = vsub.f32 %v120_v6, %v121_v8  ;;  %p734_p5 = por %p733_p4, %p732_p3 }
  0x2e   :  { %643 = vmatmul.mubr.f32.vlgmr.msra.gmra.mrb[0].mxu0 %v110_v9  ;;  %v111_v11 = vsub.f32 %v109_v7, %v110_v9  ;;  %v123_v12 = vand.u32 4294901760, %v122_v10  ;;  %p735_p6 = pnand %p734_p5, %p728_p2 }
  0x2f   :  { %646 = vmatpush3.msra.mxu0 %v121_v8  ;;  %647 = vmatprep.mubr.msk.f32.mxu0 %vm758_vm0, %v757_v0 }
  0x30   :  { %v112_v13 = vand.u32 4294901760, %v111_v11  ;;  %650 = vmatprep.subr.mxu0 %v757_v0 }
  0x32   :  { %628 = vmatmul.mubr.f32.vlgmr.msra.gmra.mrb[0].mxu1 %v112_v13 }
  0x33   :  { %631 = vmatpush3.msra.mxu1 %v123_v12  ;;  %632 = vmatprep.mubr.msk.f32.mxu1 %vm758_vm0, %v757_v0 }
  0x34   :  { %635 = vmatprep.subr.mxu1 %v757_v0 }
  0x36   :  { %648 = vmatmul.mubr.f32.vlgmr.msra.gmra.mrb[0].mxu0 %v108_v5 }
  0x37   :  { %651 = vmatpush3.msra.mxu0 %v43_v3  ;;  %652 = vmatprep.mubr.msk.f32.mxu0 %vm758_vm0, %v757_v0 }
  0x3a   :  { %633 = vmatmul.mubr.f32.vlgmr.msra.gmra.mrb[0].mxu1 %v108_v5 }
  0x3b   :  { %636 = vmatpush3.msra.mxu1 %v120_v6  ;;  %637 = vmatprep.mubr.msk.f32.mxu1 %vm758_vm0, %v757_v0 }
  0x3e   :  { %653 = vmatmul.mubr.f32.vlgmr.msra.gmra.mrb[0].mxu0 %v108_v5 }
  0x42   :  { %638 = vmatmul.mubr.f32.vlgmr.msra.gmra.mrb[0].mxu1 %v109_v7 }
 0x111   :  { %v484_v14 = vpop.f32.mrb[0].mxu0 }
 0x112   :  { %v654_v15 = vpop.f32.mrb[1].mxu0 }
 0x115   :  { %v264_v16 = vpop.f32.mrb[0].mxu1 }
 0x116   :  { %v811_v17 = vadd.f32 %v484_v14, %v264_v16  ;;  %v639_v18 = vpop.f32.mrb[1].mxu1 }
 0x118   :  { %v491_v19 = vand.u32 2139095040, %v811_v17  ;;  %v488_v23 = vand.u32 2147483647, %v811_v17  ;;  %vm490_vm9 = vcmp.lt.s32.totalorder %v811_v17, 0  ;;  %vm580_vm14 = vweird.f32 %v811_v17 }
 0x11a   :  { %v492_v20 = vshrl.u32 %v491_v19, 23  ;;  %v495_v26 = vand.u32 8388607, %v488_v23  ;;  %vm489_vm10 = vcmp.le.f32.partialorder %v488_v23, 0.7853982 }
 0x11c   :  { %v609_v21 = vadd.s32 4294967169, %v492_v20  ;;  %v496_v45 = vor.u32 8388608, %v495_v26 }
 0x11e   :  { %v498_v22 = vadd.s32 1, %v609_v21  ;;  %v536_v59 = vshll.u32 %v496_v45, 8 }
 0x120   :  { %vm499_vm2 = vcmp.gt.s32.totalorder %v498_v22, 0 }
 0x121   :  { %v500_v24 = vsel %vm499_vm2, %v498_v22, 0 }
 0x122   :  { %v502_v25 = vand.u32 31, %v500_v24  ;;  %v501_v28 = vshrl.u32 %v500_v24, 5 }
 0x124   :  { %v503_v27 = vsub.s32 32, %v502_v25  ;;  %v505_v30 = vshll.u32 %v759_v29, %v502_v25  ;;  %v508_v32 = vshll.u32 %v760_v31, %v502_v25  ;;  %v511_v36 = vshll.u32 %v761_v34, %v502_v25 }
 0x125   :  { %v514_v39 = vshll.u32 %v762_v37, %v502_v25  ;;  %v517_v42 = vshll.u32 %v763_v40, %v502_v25  ;;  %vm520_vm3 = vcmp.lt.s32.totalorder %v501_v28, 1  ;;  %vm523_vm4 = vcmp.lt.s32.totalorder %v501_v28, 4 }
 0x126   :  { %v506_v33 = vshrl.u32 %v760_v31, %v503_v27  ;;  %v509_v35 = vshrl.u32 %v761_v34, %v503_v27  ;;  %v512_v38 = vshrl.u32 %v762_v37, %v503_v27  ;;  %v515_v41 = vshrl.u32 %v763_v40, %v503_v27 }
 0x127   :  { %v518_v44 = vshrl.u32 %v764_v43, %v503_v27  ;;  %v504_v54 = vshrl.u32 %v759_v29, %v503_v27  ;;  %vm522_vm5 = vcmp.lt.s32.totalorder %v501_v28, 3  ;;  %vm521_vm6 = vcmp.lt.s32.totalorder %v501_v28, 2 }
 0x128   :  { %v507_v46 = vor.u32 %v506_v33, %v505_v30  ;;  %v510_v47 = vor.u32 %v509_v35, %v508_v32  ;;  %v513_v48 = vor.u32 %v512_v38, %v511_v36  ;;  %v516_v49 = vor.u32 %v515_v41, %v514_v39 }
 0x129   :  { %v519_v50 = vor.u32 %v518_v44, %v517_v42 }
 0x12a   :  { %v525_v51 = vsel %vm523_vm4, %v513_v48, 2102212464  ;;  %v528_v52 = vsel %vm520_vm3, %v507_v46, %v510_v47  ;;  %v532_v53 = vsel %vm520_vm3, %v510_v47, %v513_v48  ;;  %v529_v55 = vsel %vm523_vm4, %v516_v49, 920167782 }
 0x12b   :  { %v533_v56 = vsel %vm523_vm4, %v519_v50, 1326507024  ;;  %v530_v57 = vsel %vm522_vm5, %v513_v48, %v529_v55  ;;  %v524_v60 = vsel %vm520_vm3, %v504_v54, %v507_v46  ;;  %v526_v61 = vsel %vm522_vm5, %v510_v47, %v525_v51 }
 0x12c   :  { %v534_v58 = vsel %vm522_vm5, %v516_v49, %v533_v56  ;;  %v531_v62 = vsel %vm521_vm6, %v528_v52, %v530_v57  ;;  %v527_v4 = vsel %vm521_vm6, %v524_v60, %v526_v61 }
 0x12d   :  { %v535_v63 = vsel %vm521_vm6, %v532_v53, %v534_v58  ;;  %v820_v2 = vmul.u32.u64.low %v536_v59, %v531_v62  ;;  %v821_v3 = vmul.u32.u64.high %v536_v59, %v531_v62, %v820_v2  ;;  %v543_v6 = vmul.u32 %v536_v59, %v527_v4 }
 0x12e   :  { %v817_v0 = vmul.u32.u64.low %v536_v59, %v535_v63  ;;  %v818_v1 = vmul.u32.u64.high %v536_v59, %v535_v63, %v817_v0 }
 0x12f   :  { %v546_v5 = vadd.s32 1, %v821_v3 }
 0x130   :  { %vm545_vm7 = vc.u32 %v818_v1, %v820_v2  ;;  %v544_v19 = vadd.s32 %v820_v2, %v818_v1 }
 0x131   :  { %v547_v7 = vsel %vm545_vm7, %v546_v5, %v821_v3 }
 0x132   :  { %v548_v8 = vadd.s32 %v547_v7, %v543_v6 }
 0x134   :  { %v549_v9 = vadd.s32 536870912, %v548_v8 }
 0x136   :  { %v550_v10 = vshrl.u32 %v549_v9, 30 }
 0x138   :  { %v551_v11 = vshll.u32 %v550_v10, 30  ;;  %v574_v32 = vsub.s32 4, %v550_v10 }
 0x13a   :  { %v552_v12 = vsub.s32 %v548_v8, %v551_v11  ;;  %v575_v35 = vsel %vm490_vm9, %v574_v32, %v550_v10 }
 0x13b   :  { %v577_v37 = vsel %vm489_vm10, 0, %v575_v35 }
 0x13c   :  { %v554_v13 = vsub.s32 0, %v552_v12  ;;  %v581_v38 = vadd.s32 3, %v577_v37 }
 0x13e   :  { %v610_v14 = vmin.u32 %v554_v13, %v552_v12  ;;  %v582_v39 = vand.u32 3, %v581_v38 }
 0x140   :  { %v556_v15 = vclz %v610_v14  ;;  %vm587_vm11 = vcmp.eq.s32.totalorder %v582_v39, 2  ;;  %vm584_vm12 = vcmp.eq.s32.totalorder %v582_v39, 0  ;;  %vm583_vm13 = vcmp.lt.s32.totalorder %v582_v39, 2 }
 0x142   :  { %v611_v16 = vadd.s32 4294967294, %v556_v15 }
 0x144   :  { %vm612_vm8 = vcmp.lt.s32.totalorder %v611_v16, 0 }
 0x145   :  { %v559_v18 = vsel %vm612_vm8, 0, %v611_v16 }
 0x146   :  { %v560_v20 = vsub.s32 32, %v559_v18  ;;  %v564_v21 = vsub.s32 4294967266, %v559_v18  ;;  %v561_v22 = vshll.u32 %v552_v12, %v559_v18 }
 0x148   :  { %v562_v24 = vshrl.u32 %v544_v19, %v560_v20  ;;  %v565_v25 = vadd.s32 127, %v564_v21 }
 0x14a   :  { %v563_v26 = vor.u32 %v562_v24, %v561_v22  ;;  %v566_v27 = vshll.u32 %v565_v25, 23 }
 0x14c   :  { %v567_v28 = vor.u32 4788187, %v566_v27  ;;  %v570_v30 = vcvt.s32.f32 %v563_v26 }
 0x14e   :  { %v568_v29 = vand.u32 2147483647, %v567_v28 }
 0x150   :  { %v571_v31 = vmul.f32 %v570_v30, %v568_v29 }
 0x152   :  { %v572_v33 = vxor.u32 2147483648, %v571_v31 }
 0x154   :  { %v573_v34 = vsel %vm490_vm9, %v572_v33, %v571_v31 }
 0x155   :  { %v576_v36 = vsel %vm489_vm10, %v811_v17, %v573_v34 }
 0x156   :  { %679 = vcosq.f32 %v576_v36 }
 0x157   :  { %681 = vsinq.f32 %v576_v36 }
 0x160   :  { %v680_v40 = vpop.eup %679 }
 0x161   :  { %v682_v41 = vpop.eup %681  ;;  %v588_v42 = vxor.u32 2147483648, %v680_v40 }
 0x162   :  { %v585_v43 = vxor.u32 2147483648, %v682_v41 }
 0x163   :  { %v589_v44 = vsel %vm587_vm11, %v588_v42, %v682_v41 }
 0x164   :  { %v586_v45 = vsel %vm584_vm12, %v680_v40, %v585_v43 }
 0x165   :  { %v590_v23 = vsel %vm583_vm13, %v586_v45, %v589_v44 }
 0x166   :  { %v591_v46 = vsel %vm580_vm14, nan, %v590_v23 }
 0x167   :  { %592 = vst [vmem:[#allocation7] sm:$0xff] %v591_v46 }
 0x168   :  { %738 = shalt.err (!%p735_p6)
}
 0x169   :  { %s739_s8 = scalar_lea.hbm %s846_s2, 128 }
 0x16a   :  { %p740_p7 = scmp.ne.s32.totalorder %s846_s2, %s739_s8  ;;  %p743_p8 = scmp.lt.u32.totalorder %s739_s8, %s846_s2 }
 0x16c   :  { %p745_p9 = pnand %p743_p8, %p740_p7 }
 0x16e   :  { %748 = shalt.err (!%p745_p9)
}
 0x16f   :  { %602 = dma.vmem_to_hbm [thread:$0]  %s600_s4, 128, %s846_s2, [#allocation4]  }
 0x170   :  { %753 = dma.done.wait [#allocation4], 128  }
 0x171   :  { %754 = vsyncadd [#allocation4], 4294967168 }
 0x172   :  { %606 = vsyncpa [#allocation3], 1 }
 0x173   :  { %607 = vsyncpa [#allocation6], 1 }
 0x174   :  { %608 = vsyncpa [#allocation4], 1 }

</bundles_post_ra>
